<compile_context>
chip_gen: v6e
topology: v6e:2x2x1
jax: 0.10.0
libtpu: 0.0.40
codegen_flags: <defaults>
</compile_context>

<pallas_src>
import jax
import jax.numpy as jnp
from jax.experimental import pallas as pl
from jax.experimental.pallas import tpu as pltpu


def _round_up(n: int, m: int) -> int:
    return ((n + m - 1) // m) * m


def _mlp_kernel(x_ref, w1_ref, b1_ref, w2_ref, b2_ref, o_ref):
    """x_ref: (4, TB) VMEM tile, batch on lanes.  Params live in SMEM.
    o_ref: (2, TB)."""
    hid_f, in_f = w1_ref.shape          # (5, 4)
    out_f = w2_ref.shape[0]             # 2

    # Lane-dense (1, TB) rows of the input tile.
    x_rows = [x_ref[k:k + 1, :] for k in range(in_f)]

    # fc1 + ReLU: fully unrolled scalar*vector FMAs on the VPU (K=4 is far too
    # small to be worth an MXU pass).
    h_rows = []
    for j in range(hid_f):
        acc = x_rows[0] * w1_ref[j, 0]
        for k in range(1, in_f):
            acc = acc + x_rows[k] * w1_ref[j, k]
        h_rows.append(jnp.maximum(acc + b1_ref[j, 0], 0.0))

    # fc2: each output row is a lane-dense (1, TB) store.
    for i in range(out_f):
        acc = h_rows[0] * w2_ref[i, 0]
        for j in range(1, hid_f):
            acc = acc + h_rows[j] * w2_ref[i, j]
        o_ref[i:i + 1, :] = (acc + b2_ref[i, 0]).astype(o_ref.dtype)


def simple_nn_forward(x, w1, b1, w2, b2, *, tb=2048):
    """SimpleNN forward.

    x : (B, 4) f32;  w1 : (4, 5);  b1 : (5,);  w2 : (5, 2);  b2 : (2,).
    Returns (B, 2) f32.

    Note: at tiny B the call is pure launch overhead and plain XLA fusion is
    preferable; the Pallas path pays off at large batch.
    """
    B = x.shape[0]
    in_f, hid_f = w1.shape
    out_f = w2.shape[1]

    # Lane tile: multiple of 128, no larger than the (padded) batch needs.
    tb = max(128, min(_round_up(tb, 128), _round_up(B, 128)))
    bp = _round_up(B, tb)
    n_tiles = bp // tb

    # Transposed, lane-dense operands (wrapper-side layout plumbing only).
    xt = x.T                                                  # (4, B)
    if bp != B:
        xt = jnp.pad(xt, ((0, 0), (0, bp - B)))               # (4, Bp)
    w1t = w1.T                                                # (5, 4)
    w2t = w2.T                                                # (2, 5)
    b1c = b1.reshape(hid_f, 1)                                # (5, 1)
    b2c = b2.reshape(out_f, 1)                                # (2, 1)

    smem = pltpu.MemorySpace.SMEM
    yt = pl.pallas_call(
        _mlp_kernel,
        out_shape=jax.ShapeDtypeStruct((out_f, bp), jnp.float32),
        grid=(n_tiles,),
        in_specs=[
            pl.BlockSpec((in_f, tb), lambda i: (0, i)),                        # x tile (VMEM)
            pl.BlockSpec((hid_f, in_f), lambda i: (0, 0), memory_space=smem),  # W1ᵀ (SMEM, resident)
            pl.BlockSpec((hid_f, 1), lambda i: (0, 0), memory_space=smem),     # b1
            pl.BlockSpec((out_f, hid_f), lambda i: (0, 0), memory_space=smem), # W2ᵀ
            pl.BlockSpec((out_f, 1), lambda i: (0, 0), memory_space=smem),     # b2
        ],
        out_specs=pl.BlockSpec((out_f, tb), lambda i: (0, i)),
        compiler_params=pltpu.CompilerParams(
            dimension_semantics=("parallel",),   # shard batch over v7x's 2 TCs
        ),
        cost_estimate=pl.CostEstimate(
            flops=2 * B * (in_f * hid_f + hid_f * out_f),
            transcendentals=0,
            bytes_accessed=4 * (B * (in_f + out_f)
                                + in_f * hid_f + hid_f * out_f + hid_f + out_f),
        ),
    )(xt, w1t, b1c, w2t, b2c)

    return yt[:, :B].T                                        # back to (B, 2)


def _reference(x, w1, b1, w2, b2):
    h = jnp.maximum(x @ w1 + b1, 0.0)
    return h @ w2 + b2


if __name__ == "__main__":
    key = jax.random.PRNGKey(0)
    k_x, k_w1, k_b1, k_w2, k_b2, k_x2 = jax.random.split(key, 6)

    # Deterministic PyTorch-style init (uniform(-1/sqrt(fan_in), +)),
    # stored as (in, out) for the wrapper.
    lim1 = 1.0 / jnp.sqrt(4.0)
    w1 = jax.random.uniform(k_w1, (4, 5), jnp.float32, -lim1, lim1)
    b1 = jax.random.uniform(k_b1, (5,), jnp.float32, -lim1, lim1)
    lim2 = 1.0 / jnp.sqrt(5.0)
    w2 = jax.random.uniform(k_w2, (5, 2), jnp.float32, -lim2, lim2)
    b2 = jax.random.uniform(k_b2, (2,), jnp.float32, -lim2, lim2)

    # Small-batch check (single grid step, lane padding path).
    B = 8
    x = jax.random.normal(k_x, (B, 4), dtype=jnp.float32)
    out = jax.block_until_ready(simple_nn_forward(x, w1, b1, w2, b2))
    ref = _reference(x, w1, b1, w2, b2)
    assert out.shape == (B, 2)
    assert jnp.allclose(out, ref, atol=1e-5, rtol=1e-5)

    # Multi-tile check: exercises the batch grid + padding path (3 tiles).
    B2 = 300
    x2 = jax.random.normal(k_x2, (B2, 4), dtype=jnp.float32)
    out2 = jax.block_until_ready(simple_nn_forward(x2, w1, b1, w2, b2, tb=128))
    ref2 = _reference(x2, w1, b1, w2, b2)
    assert out2.shape == (B2, 2)
    assert jnp.allclose(out2, ref2, atol=1e-5, rtol=1e-5)

    print("KERNEL_OK")
</pallas_src>

<mosaic_0001>
module attributes {stable_mosaic.version = 11 : i64} {
  func.func @_mlp_kernel(%arg0: i32, %arg1: memref<4x128xf32, #tpu.memory_space<vmem>>, %arg2: memref<5x4xf32, #tpu.memory_space<smem>>, %arg3: memref<5x1xf32, #tpu.memory_space<smem>>, %arg4: memref<2x5xf32, #tpu.memory_space<smem>>, %arg5: memref<2x1xf32, #tpu.memory_space<smem>>, %arg6: memref<2x128xf32, #tpu.memory_space<vmem>>) attributes {dimension_semantics = [#tpu.dimension_semantics<parallel>], iteration_bounds = array<i64: 1>, scalar_prefetch = 0 : i64, scratch_operands = 0 : i64, tpu.core_type = #tpu.core_type<tc>, window_params = [{transform_indices = @transform_0, window_bounds = array<i64: 4, 128>}, {transform_indices = @transform_1, window_bounds = array<i64: 5, 4>}, {transform_indices = @transform_2, window_bounds = array<i64: 5, 1>}, {transform_indices = @transform_3, window_bounds = array<i64: 2, 5>}, {transform_indices = @transform_4, window_bounds = array<i64: 2, 1>}, {transform_indices = @transform_5, window_bounds = array<i64: 2, 128>}]} {
    %c0 = arith.constant 0 : index
    %c0_0 = arith.constant 0 : index
    %0 = vector.load %arg1[%c0, %c0_0] : memref<4x128xf32, #tpu.memory_space<vmem>>, vector<1x128xf32>
    %c1 = arith.constant 1 : index
    %c0_1 = arith.constant 0 : index
    %1 = vector.load %arg1[%c1, %c0_1] : memref<4x128xf32, #tpu.memory_space<vmem>>, vector<1x128xf32>
    %c2 = arith.constant 2 : index
    %c0_2 = arith.constant 0 : index
    %2 = vector.load %arg1[%c2, %c0_2] : memref<4x128xf32, #tpu.memory_space<vmem>>, vector<1x128xf32>
    %c3 = arith.constant 3 : index
    %c0_3 = arith.constant 0 : index
    %3 = vector.load %arg1[%c3, %c0_3] : memref<4x128xf32, #tpu.memory_space<vmem>>, vector<1x128xf32>
    %c0_4 = arith.constant 0 : index
    %c0_5 = arith.constant 0 : index
    %4 = memref.load %arg2[%c0_4, %c0_5] : memref<5x4xf32, #tpu.memory_space<smem>>
    %5 = vector.broadcast %4 : f32 to vector<1x128xf32>
    %6 = arith.mulf %0, %5 : vector<1x128xf32>
    %c0_6 = arith.constant 0 : index
    %c1_7 = arith.constant 1 : index
    %7 = memref.load %arg2[%c0_6, %c1_7] : memref<5x4xf32, #tpu.memory_space<smem>>
    %8 = vector.broadcast %7 : f32 to vector<1x128xf32>
    %9 = arith.mulf %1, %8 : vector<1x128xf32>
    %10 = arith.addf %6, %9 : vector<1x128xf32>
    %c0_8 = arith.constant 0 : index
    %c2_9 = arith.constant 2 : index
    %11 = memref.load %arg2[%c0_8, %c2_9] : memref<5x4xf32, #tpu.memory_space<smem>>
    %12 = vector.broadcast %11 : f32 to vector<1x128xf32>
    %13 = arith.mulf %2, %12 : vector<1x128xf32>
    %14 = arith.addf %10, %13 : vector<1x128xf32>
    %c0_10 = arith.constant 0 : index
    %c3_11 = arith.constant 3 : index
    %15 = memref.load %arg2[%c0_10, %c3_11] : memref<5x4xf32, #tpu.memory_space<smem>>
    %16 = vector.broadcast %15 : f32 to vector<1x128xf32>
    %17 = arith.mulf %3, %16 : vector<1x128xf32>
    %18 = arith.addf %14, %17 : vector<1x128xf32>
    %c0_12 = arith.constant 0 : index
    %c0_13 = arith.constant 0 : index
    %19 = memref.load %arg3[%c0_12, %c0_13] : memref<5x1xf32, #tpu.memory_space<smem>>
    %20 = vector.broadcast %19 : f32 to vector<1x128xf32>
    %21 = arith.addf %18, %20 : vector<1x128xf32>
    %cst = arith.constant 0.000000e+00 : f32
    %22 = vector.broadcast %cst : f32 to vector<1x128xf32>
    %23 = arith.maximumf %21, %22 : vector<1x128xf32>
    %c1_14 = arith.constant 1 : index
    %c0_15 = arith.constant 0 : index
    %24 = memref.load %arg2[%c1_14, %c0_15] : memref<5x4xf32, #tpu.memory_space<smem>>
    %25 = vector.broadcast %24 : f32 to vector<1x128xf32>
    %26 = arith.mulf %0, %25 : vector<1x128xf32>
    %c1_16 = arith.constant 1 : index
    %c1_17 = arith.constant 1 : index
    %27 = memref.load %arg2[%c1_16, %c1_17] : memref<5x4xf32, #tpu.memory_space<smem>>
    %28 = vector.broadcast %27 : f32 to vector<1x128xf32>
    %29 = arith.mulf %1, %28 : vector<1x128xf32>
    %30 = arith.addf %26, %29 : vector<1x128xf32>
    %c1_18 = arith.constant 1 : index
    %c2_19 = arith.constant 2 : index
    %31 = memref.load %arg2[%c1_18, %c2_19] : memref<5x4xf32, #tpu.memory_space<smem>>
    %32 = vector.broadcast %31 : f32 to vector<1x128xf32>
    %33 = arith.mulf %2, %32 : vector<1x128xf32>
    %34 = arith.addf %30, %33 : vector<1x128xf32>
    %c1_20 = arith.constant 1 : index
    %c3_21 = arith.constant 3 : index
    %35 = memref.load %arg2[%c1_20, %c3_21] : memref<5x4xf32, #tpu.memory_space<smem>>
    %36 = vector.broadcast %35 : f32 to vector<1x128xf32>
    %37 = arith.mulf %3, %36 : vector<1x128xf32>
    %38 = arith.addf %34, %37 : vector<1x128xf32>
    %c1_22 = arith.constant 1 : index
    %c0_23 = arith.constant 0 : index
    %39 = memref.load %arg3[%c1_22, %c0_23] : memref<5x1xf32, #tpu.memory_space<smem>>
    %40 = vector.broadcast %39 : f32 to vector<1x128xf32>
    %41 = arith.addf %38, %40 : vector<1x128xf32>
    %cst_24 = arith.constant 0.000000e+00 : f32
    %42 = vector.broadcast %cst_24 : f32 to vector<1x128xf32>
    %43 = arith.maximumf %41, %42 : vector<1x128xf32>
    %c2_25 = arith.constant 2 : index
    %c0_26 = arith.constant 0 : index
    %44 = memref.load %arg2[%c2_25, %c0_26] : memref<5x4xf32, #tpu.memory_space<smem>>
    %45 = vector.broadcast %44 : f32 to vector<1x128xf32>
    %46 = arith.mulf %0, %45 : vector<1x128xf32>
    %c2_27 = arith.constant 2 : index
    %c1_28 = arith.constant 1 : index
    %47 = memref.load %arg2[%c2_27, %c1_28] : memref<5x4xf32, #tpu.memory_space<smem>>
    %48 = vector.broadcast %47 : f32 to vector<1x128xf32>
    %49 = arith.mulf %1, %48 : vector<1x128xf32>
    %50 = arith.addf %46, %49 : vector<1x128xf32>
    %c2_29 = arith.constant 2 : index
    %c2_30 = arith.constant 2 : index
    %51 = memref.load %arg2[%c2_29, %c2_30] : memref<5x4xf32, #tpu.memory_space<smem>>
    %52 = vector.broadcast %51 : f32 to vector<1x128xf32>
    %53 = arith.mulf %2, %52 : vector<1x128xf32>
    %54 = arith.addf %50, %53 : vector<1x128xf32>
    %c2_31 = arith.constant 2 : index
    %c3_32 = arith.constant 3 : index
    %55 = memref.load %arg2[%c2_31, %c3_32] : memref<5x4xf32, #tpu.memory_space<smem>>
    %56 = vector.broadcast %55 : f32 to vector<1x128xf32>
    %57 = arith.mulf %3, %56 : vector<1x128xf32>
    %58 = arith.addf %54, %57 : vector<1x128xf32>
    %c2_33 = arith.constant 2 : index
    %c0_34 = arith.constant 0 : index
    %59 = memref.load %arg3[%c2_33, %c0_34] : memref<5x1xf32, #tpu.memory_space<smem>>
    %60 = vector.broadcast %59 : f32 to vector<1x128xf32>
    %61 = arith.addf %58, %60 : vector<1x128xf32>
    %cst_35 = arith.constant 0.000000e+00 : f32
    %62 = vector.broadcast %cst_35 : f32 to vector<1x128xf32>
    %63 = arith.maximumf %61, %62 : vector<1x128xf32>
    %c3_36 = arith.constant 3 : index
    %c0_37 = arith.constant 0 : index
    %64 = memref.load %arg2[%c3_36, %c0_37] : memref<5x4xf32, #tpu.memory_space<smem>>
    %65 = vector.broadcast %64 : f32 to vector<1x128xf32>
    %66 = arith.mulf %0, %65 : vector<1x128xf32>
    %c3_38 = arith.constant 3 : index
    %c1_39 = arith.constant 1 : index
    %67 = memref.load %arg2[%c3_38, %c1_39] : memref<5x4xf32, #tpu.memory_space<smem>>
    %68 = vector.broadcast %67 : f32 to vector<1x128xf32>
    %69 = arith.mulf %1, %68 : vector<1x128xf32>
    %70 = arith.addf %66, %69 : vector<1x128xf32>
    %c3_40 = arith.constant 3 : index
    %c2_41 = arith.constant 2 : index
    %71 = memref.load %arg2[%c3_40, %c2_41] : memref<5x4xf32, #tpu.memory_space<smem>>
    %72 = vector.broadcast %71 : f32 to vector<1x128xf32>
    %73 = arith.mulf %2, %72 : vector<1x128xf32>
    %74 = arith.addf %70, %73 : vector<1x128xf32>
    %c3_42 = arith.constant 3 : index
    %c3_43 = arith.constant 3 : index
    %75 = memref.load %arg2[%c3_42, %c3_43] : memref<5x4xf32, #tpu.memory_space<smem>>
    %76 = vector.broadcast %75 : f32 to vector<1x128xf32>
    %77 = arith.mulf %3, %76 : vector<1x128xf32>
    %78 = arith.addf %74, %77 : vector<1x128xf32>
    %c3_44 = arith.constant 3 : index
    %c0_45 = arith.constant 0 : index
    %79 = memref.load %arg3[%c3_44, %c0_45] : memref<5x1xf32, #tpu.memory_space<smem>>
    %80 = vector.broadcast %79 : f32 to vector<1x128xf32>
    %81 = arith.addf %78, %80 : vector<1x128xf32>
    %cst_46 = arith.constant 0.000000e+00 : f32
    %82 = vector.broadcast %cst_46 : f32 to vector<1x128xf32>
    %83 = arith.maximumf %81, %82 : vector<1x128xf32>
    %c4 = arith.constant 4 : index
    %c0_47 = arith.constant 0 : index
    %84 = memref.load %arg2[%c4, %c0_47] : memref<5x4xf32, #tpu.memory_space<smem>>
    %85 = vector.broadcast %84 : f32 to vector<1x128xf32>
    %86 = arith.mulf %0, %85 : vector<1x128xf32>
    %c4_48 = arith.constant 4 : index
    %c1_49 = arith.constant 1 : index
    %87 = memref.load %arg2[%c4_48, %c1_49] : memref<5x4xf32, #tpu.memory_space<smem>>
    %88 = vector.broadcast %87 : f32 to vector<1x128xf32>
    %89 = arith.mulf %1, %88 : vector<1x128xf32>
    %90 = arith.addf %86, %89 : vector<1x128xf32>
    %c4_50 = arith.constant 4 : index
    %c2_51 = arith.constant 2 : index
    %91 = memref.load %arg2[%c4_50, %c2_51] : memref<5x4xf32, #tpu.memory_space<smem>>
    %92 = vector.broadcast %91 : f32 to vector<1x128xf32>
    %93 = arith.mulf %2, %92 : vector<1x128xf32>
    %94 = arith.addf %90, %93 : vector<1x128xf32>
    %c4_52 = arith.constant 4 : index
    %c3_53 = arith.constant 3 : index
    %95 = memref.load %arg2[%c4_52, %c3_53] : memref<5x4xf32, #tpu.memory_space<smem>>
    %96 = vector.broadcast %95 : f32 to vector<1x128xf32>
    %97 = arith.mulf %3, %96 : vector<1x128xf32>
    %98 = arith.addf %94, %97 : vector<1x128xf32>
    %c4_54 = arith.constant 4 : index
    %c0_55 = arith.constant 0 : index
    %99 = memref.load %arg3[%c4_54, %c0_55] : memref<5x1xf32, #tpu.memory_space<smem>>
    %100 = vector.broadcast %99 : f32 to vector<1x128xf32>
    %101 = arith.addf %98, %100 : vector<1x128xf32>
    %cst_56 = arith.constant 0.000000e+00 : f32
    %102 = vector.broadcast %cst_56 : f32 to vector<1x128xf32>
    %103 = arith.maximumf %101, %102 : vector<1x128xf32>
    %c0_57 = arith.constant 0 : index
    %c0_58 = arith.constant 0 : index
    %104 = memref.load %arg4[%c0_57, %c0_58] : memref<2x5xf32, #tpu.memory_space<smem>>
    %105 = vector.broadcast %104 : f32 to vector<1x128xf32>
    %106 = arith.mulf %23, %105 : vector<1x128xf32>
    %c0_59 = arith.constant 0 : index
    %c1_60 = arith.constant 1 : index
    %107 = memref.load %arg4[%c0_59, %c1_60] : memref<2x5xf32, #tpu.memory_space<smem>>
    %108 = vector.broadcast %107 : f32 to vector<1x128xf32>
    %109 = arith.mulf %43, %108 : vector<1x128xf32>
    %110 = arith.addf %106, %109 : vector<1x128xf32>
    %c0_61 = arith.constant 0 : index
    %c2_62 = arith.constant 2 : index
    %111 = memref.load %arg4[%c0_61, %c2_62] : memref<2x5xf32, #tpu.memory_space<smem>>
    %112 = vector.broadcast %111 : f32 to vector<1x128xf32>
    %113 = arith.mulf %63, %112 : vector<1x128xf32>
    %114 = arith.addf %110, %113 : vector<1x128xf32>
    %c0_63 = arith.constant 0 : index
    %c3_64 = arith.constant 3 : index
    %115 = memref.load %arg4[%c0_63, %c3_64] : memref<2x5xf32, #tpu.memory_space<smem>>
    %116 = vector.broadcast %115 : f32 to vector<1x128xf32>
    %117 = arith.mulf %83, %116 : vector<1x128xf32>
    %118 = arith.addf %114, %117 : vector<1x128xf32>
    %c0_65 = arith.constant 0 : index
    %c4_66 = arith.constant 4 : index
    %119 = memref.load %arg4[%c0_65, %c4_66] : memref<2x5xf32, #tpu.memory_space<smem>>
    %120 = vector.broadcast %119 : f32 to vector<1x128xf32>
    %121 = arith.mulf %103, %120 : vector<1x128xf32>
    %122 = arith.addf %118, %121 : vector<1x128xf32>
    %c0_67 = arith.constant 0 : index
    %c0_68 = arith.constant 0 : index
    %123 = memref.load %arg5[%c0_67, %c0_68] : memref<2x1xf32, #tpu.memory_space<smem>>
    %124 = vector.broadcast %123 : f32 to vector<1x128xf32>
    %125 = arith.addf %122, %124 : vector<1x128xf32>
    %c0_69 = arith.constant 0 : index
    %c0_70 = arith.constant 0 : index
    %126 = vector.load %arg6[%c0_69, %c0_70] : memref<2x128xf32, #tpu.memory_space<vmem>>, vector<1x128xf32>
    tpu.vector_store %arg6[%c0_69, %c0_70], %125 {strides = array<i32>} : memref<2x128xf32, #tpu.memory_space<vmem>>, vector<1x128xf32>,
    %c1_71 = arith.constant 1 : index
    %c0_72 = arith.constant 0 : index
    %127 = memref.load %arg4[%c1_71, %c0_72] : memref<2x5xf32, #tpu.memory_space<smem>>
    %128 = vector.broadcast %127 : f32 to vector<1x128xf32>
    %129 = arith.mulf %23, %128 : vector<1x128xf32>
    %c1_73 = arith.constant 1 : index
    %c1_74 = arith.constant 1 : index
    %130 = memref.load %arg4[%c1_73, %c1_74] : memref<2x5xf32, #tpu.memory_space<smem>>
    %131 = vector.broadcast %130 : f32 to vector<1x128xf32>
    %132 = arith.mulf %43, %131 : vector<1x128xf32>
    %133 = arith.addf %129, %132 : vector<1x128xf32>
    %c1_75 = arith.constant 1 : index
    %c2_76 = arith.constant 2 : index
    %134 = memref.load %arg4[%c1_75, %c2_76] : memref<2x5xf32, #tpu.memory_space<smem>>
    %135 = vector.broadcast %134 : f32 to vector<1x128xf32>
    %136 = arith.mulf %63, %135 : vector<1x128xf32>
    %137 = arith.addf %133, %136 : vector<1x128xf32>
    %c1_77 = arith.constant 1 : index
    %c3_78 = arith.constant 3 : index
    %138 = memref.load %arg4[%c1_77, %c3_78] : memref<2x5xf32, #tpu.memory_space<smem>>
    %139 = vector.broadcast %138 : f32 to vector<1x128xf32>
    %140 = arith.mulf %83, %139 : vector<1x128xf32>
    %141 = arith.addf %137, %140 : vector<1x128xf32>
    %c1_79 = arith.constant 1 : index
    %c4_80 = arith.constant 4 : index
    %142 = memref.load %arg4[%c1_79, %c4_80] : memref<2x5xf32, #tpu.memory_space<smem>>
    %143 = vector.broadcast %142 : f32 to vector<1x128xf32>
    %144 = arith.mulf %103, %143 : vector<1x128xf32>
    %145 = arith.addf %141, %144 : vector<1x128xf32>
    %c1_81 = arith.constant 1 : index
    %c0_82 = arith.constant 0 : index
    %146 = memref.load %arg5[%c1_81, %c0_82] : memref<2x1xf32, #tpu.memory_space<smem>>
    %147 = vector.broadcast %146 : f32 to vector<1x128xf32>
    %148 = arith.addf %145, %147 : vector<1x128xf32>
    %c1_83 = arith.constant 1 : index
    %c0_84 = arith.constant 0 : index
    %149 = vector.load %arg6[%c1_83, %c0_84] : memref<2x128xf32, #tpu.memory_space<vmem>>, vector<1x128xf32>
    tpu.vector_store %arg6[%c1_83, %c0_84], %148 {strides = array<i32>} : memref<2x128xf32, #tpu.memory_space<vmem>>, vector<1x128xf32>,
    return
  }
  func.func @transform_0(%arg0: i32) -> (i32, i32) {
    %c0_i32 = arith.constant 0 : i32
    %c0_i32_0 = arith.constant 0 : i32
    return %c0_i32, %arg0 : i32, i32
  }
  func.func @transform_1(%arg0: i32) -> (i32, i32) {
    %c0_i32 = arith.constant 0 : i32
    %c0_i32_0 = arith.constant 0 : i32
    %c0_i32_1 = arith.constant 0 : i32
    return %c0_i32, %c0_i32_0 : i32, i32
  }
  func.func @transform_2(%arg0: i32) -> (i32, i32) {
    %c0_i32 = arith.constant 0 : i32
    %c0_i32_0 = arith.constant 0 : i32
    %c0_i32_1 = arith.constant 0 : i32
    return %c0_i32, %c0_i32_0 : i32, i32
  }
  func.func @transform_3(%arg0: i32) -> (i32, i32) {
    %c0_i32 = arith.constant 0 : i32
    %c0_i32_0 = arith.constant 0 : i32
    %c0_i32_1 = arith.constant 0 : i32
    return %c0_i32, %c0_i32_0 : i32, i32
  }
  func.func @transform_4(%arg0: i32) -> (i32, i32) {
    %c0_i32 = arith.constant 0 : i32
    %c0_i32_0 = arith.constant 0 : i32
    %c0_i32_1 = arith.constant 0 : i32
    return %c0_i32, %c0_i32_0 : i32, i32
  }
  func.func @transform_5(%arg0: i32) -> (i32, i32) {
    %c0_i32 = arith.constant 0 : i32
    %c0_i32_0 = arith.constant 0 : i32
    return %c0_i32, %arg0 : i32, i32
  }
}

</mosaic_0001>

<bundles_post_ra>
// kernel: tpu_custom_call.1
= control target key start
LH: loop header
LB: loop body
LE: loop exit
PB: predicated region body
PF: predicated region fallthrough
CT: control target
= control target key end

     0   :  { %10 = vsyncpa [#allocation4], 0  ;;  %s459_s0 = inlined_call_operand.vmem [shape: f32[4,128], index: 0, kind: input, shape index: {}]   ;;  %s460_s1 = inlined_call_operand.vmem [shape: f32[5,4], index: 1, kind: input, shape index: {}]   ;;  %s461_s2 = inlined_call_operand.vmem [shape: f32[5,1], index: 2, kind: input, shape index: {}]   ;;  %s462_s3 = inlined_call_operand.vmem [shape: f32[2,5], index: 3, kind: input, shape index: {}]   ;;  %s463_s4 = inlined_call_operand.vmem [shape: f32[2,1], index: 4, kind: input, shape index: {}]   ;;  %s464_s5 = inlined_call_operand.hbm [shape: f32[2,128], index: 5, kind: output, shape index: {}]  }
   0x1   :  { %11 = vsyncpa [#allocation6], 0 }
   0x2   :  { %12 = vsyncpa [#allocation9], 0  ;;  %s32_s20 = sshll.u32 %s461_s2, 4  ;;  %s33_s20 = int_to_ptr.vmem [resolvable:$true] %s32_s20 }
   0x3   :  { %13 = vsyncpa [#allocation3], 0  ;;  %s22_s23 = sshll.u32 %s460_s1, 4  ;;  %s269_s24 = scalar_lea.vmem %s33_s20, 128  ;;  %s23_s23 = int_to_ptr.vmem [resolvable:$true] %s22_s23 }
   0x4   :  { %p270_p0 = scmp.ne.s32.totalorder %s33_s20, %s269_s24  ;;  %p274_p1 = scmp.lt.s32.totalorder %s33_s20, %s33_s20 }
   0x5   :  { %p275_p2 = scmp.lt.s32.totalorder %s269_s24, %s269_s24 }
   0x7   :  { %p276_p3 = por %p275_p2, %p274_p1 }
   0x9   :  { %p277_p4 = pnand %p276_p3, %p270_p0 }
   0xb   :  { %280 = shalt.err (!%p277_p4)
}
   0xc   :  { %s345_s25 = smov [#allocation5]   ;;  %s281_s26 = scalar_lea.vmem %s23_s23, 128 }
   0xd   :  { %35 = dma.vmem_to_smem %s33_s20, 128, %s345_s25, [#allocation6]  }
   0xe   :  { %p282_p5 = scmp.ne.s32.totalorder %s23_s23, %s281_s26  ;;  %p286_p6 = scmp.lt.s32.totalorder %s23_s23, %s23_s23 }
   0xf   :  { %p287_p7 = scmp.lt.s32.totalorder %s281_s26, %s281_s26 }
  0x11   :  { %p288_p8 = por %p287_p7, %p286_p6 }
  0x13   :  { %p289_p9 = pnand %p288_p8, %p282_p5 }
  0x15   :  { %292 = shalt.err (!%p289_p9)
}
  0x16   :  { %s346_s2 = smov [#allocation2]   ;;  %s42_s28 = sshll.u32 %s462_s3, 4  ;;  %s43_s28 = int_to_ptr.vmem [resolvable:$true] %s42_s28 }
  0x17   :  { %25 = dma.vmem_to_smem %s23_s23, 128, %s346_s2, [#allocation4]  }
  0x18   :  { %s52_s6 = sshll.u32 %s463_s4, 4  ;;  %s293_s7 = scalar_lea.vmem %s43_s28, 32  ;;  %s53_s6 = int_to_ptr.vmem [resolvable:$true] %s52_s6 }
  0x19   :  { %p294_p10 = scmp.ne.s32.totalorder %s43_s28, %s293_s7  ;;  %p298_p11 = scmp.lt.s32.totalorder %s43_s28, %s43_s28 }
  0x1a   :  { %p299_p12 = scmp.lt.s32.totalorder %s293_s7, %s293_s7 }
  0x1c   :  { %p300_p13 = por %p299_p12, %p298_p11 }
  0x1e   :  { %p301_p0 = pnand %p300_p13, %p294_p10 }
  0x20   :  { %304 = shalt.err (!%p301_p0)
}
  0x21   :  { %s347_s8 = smov [#allocation7]   ;;  %s305_s9 = scalar_lea.vmem %s53_s6, 32 }
  0x22   :  { %45 = dma.vmem_to_smem %s43_s28, 32, %s347_s8, [#allocation6]  }
  0x23   :  { %p306_p1 = scmp.ne.s32.totalorder %s53_s6, %s305_s9  ;;  %p310_p2 = scmp.lt.s32.totalorder %s53_s6, %s53_s6 }
  0x24   :  { %p311_p3 = scmp.lt.s32.totalorder %s305_s9, %s305_s9 }
  0x26   :  { %p312_p4 = por %p311_p3, %p310_p2 }
  0x28   :  { %p313_p5 = pnand %p312_p4, %p306_p1 }
  0x2a   :  { %316 = shalt.err (!%p313_p5)
}
  0x2b   :  { %s348_s3 = smov [#allocation8]  }
  0x2c   :  { %55 = dma.vmem_to_smem %s53_s6, 32, %s348_s3, [#allocation9]  }
  0x2d   :  { %337 = dma.done.wait [#allocation4], 128  }
  0x2e   :  { %338 = vsyncadd [#allocation4], 4294967168 }
  0x2f   :  { %339 = dma.done.wait [#allocation6], 160  }
  0x30   :  { %340 = vsyncadd [#allocation6], 4294967136 }
  0x31   :  { %341 = dma.done.wait [#allocation9], 32  }
  0x32   :  { %342 = vsyncadd [#allocation9], 4294967264 }
  0x33   :  { %68 = sfence }
  0x34   :  { %s73_s4 = sld [smem:[#allocation2]]  ;;  %v399_v0 = vld [vmem:[%s459_s0] sm:$0x1]  ;;  %v404_v1 = vld [vmem:[%s459_s0 + $0x1] sm:$0x1] }
  0x35   :  { %s231_s10 = sld [smem:[#allocation2 + $0x1]]  ;;  %v411_v6 = vld [vmem:[%s459_s0 + $0x2] sm:$0x1]  ;;  %v420_v13 = vld [vmem:[%s459_s0 + $0x3] sm:$0x1] }
  0x36   :  { %s232_s11 = sld [smem:[#allocation2 + $0x2]] }
  0x37   :  { %s392_s12 = sld [smem:[#allocation2 + $0x3]] }
  0x38   :  { %s394_s13 = sld [smem:[#allocation5]] }
  0x39   :  { %s234_s18 = sld [smem:[#allocation2 + $0x80]] }
  0x3a   :  { %v74_v2 = vstv %s73_s4  ;;  %s235_s19 = sld [smem:[#allocation2 + $0x81]] }
  0x3b   :  { %v77_v3 = vstv %s231_s10  ;;  %s236_s20 = sld [smem:[#allocation2 + $0x82]]  ;;  %v75_v4 = vmul.f32 %v74_v2, %v399_v0 }
  0x3c   :  { %v78_v5 = vmul.f32 %v77_v3, %v404_v1  ;;  %s237_s21 = sld [smem:[#allocation2 + $0x83]]  ;;  %v81_v7 = vstv %s232_s11 }
  0x3d   :  { %s413_s24 = sld [smem:[#allocation5 + $0x80]]  ;;  %v82_v10 = vmul.f32 %v81_v7, %v411_v6  ;;  %v85_v14 = vstv %s392_s12 }
  0x3e   :  { %s239_s25 = sld [smem:[#allocation2 + $0x100]]  ;;  %v79_v9 = vadd.f32 %v78_v5, %v75_v4  ;;  %v86_v21 = vmul.f32 %v85_v14, %v420_v13  ;;  %v89_v34 = vstv %s394_s13 }
  0x3f   :  { %v93_v8 = vstv %s234_s18  ;;  %s240_s26 = sld [smem:[#allocation2 + $0x101]] }
  0x40   :  { %v94_v11 = vmul.f32 %v93_v8, %v399_v0  ;;  %v96_v12 = vstv %s235_s19  ;;  %s241_s2 = sld [smem:[#allocation2 + $0x102]]  ;;  %v83_v20 = vadd.f32 %v82_v10, %v79_v9 }
  0x41   :  { %v97_v15 = vmul.f32 %v96_v12, %v404_v1  ;;  %v100_v16 = vstv %s236_s20  ;;  %s242_s28 = sld [smem:[#allocation2 + $0x103]] }
  0x42   :  { %v101_v17 = vmul.f32 %v100_v16, %v411_v6  ;;  %v104_v18 = vstv %s237_s21  ;;  %s425_s29 = sld [smem:[#allocation5 + $0x100]]  ;;  %v87_v31 = vadd.f32 %v86_v21, %v83_v20 }
  0x43   :  { %v98_v19 = vadd.f32 %v97_v15, %v94_v11  ;;  %s244_s30 = sld [smem:[#allocation2 + $0x180]]  ;;  %v105_v24 = vmul.f32 %v104_v18, %v420_v13  ;;  %v108_v37 = vstv %s413_s24  ;;  %s349_s24 = smov [#allocation10]  }
  0x44   :  { %v112_v22 = vstv %s239_s25  ;;  %s245_s6 = sld [smem:[#allocation2 + $0x181]]  ;;  %v90_v44 = vadd.f32 %v89_v34, %v87_v31  ;;  %s220_s25 = sshll.u32 %s349_s24, 4  ;;  %s221_s25 = int_to_ptr.vmem [resolvable:$true] %s220_s25 }
  0x45   :  { %v102_v23 = vadd.f32 %v101_v17, %v98_v19  ;;  %v113_v25 = vmul.f32 %v112_v22, %v399_v0  ;;  %v115_v26 = vstv %s240_s26  ;;  %s246_s0 = sld [smem:[#allocation2 + $0x182]]  ;;  %s317_s26 = scalar_lea.vmem %s221_s25, 32 }
  0x46   :  { %v116_v27 = vmul.f32 %v115_v26, %v404_v1  ;;  %v119_v28 = vstv %s241_s2  ;;  %s247_s7 = sld [smem:[#allocation2 + $0x183]]  ;;  %v91_v56 = vmax.f32 %v90_v44, 0.0  ;;  %p318_p6 = scmp.ne.s32.totalorder %s221_s25, %s317_s26 }
  0x47   :  { %v120_v29 = vmul.f32 %v119_v28, %v411_v6  ;;  %v123_v30 = vstv %s242_s28  ;;  %s432_s8 = sld [smem:[#allocation5 + $0x180]]  ;;  %v106_v35 = vadd.f32 %v105_v24, %v102_v23  ;;  %p322_p7 = scmp.lt.s32.totalorder %s221_s25, %s221_s25 }
  0x48   :  { %v117_v32 = vadd.f32 %v116_v27, %v113_v25  ;;  %v124_v33 = vmul.f32 %v123_v30, %v420_v13  ;;  %s249_s9 = sld [smem:[#allocation2 + $0x200]]  ;;  %v127_v41 = vstv %s425_s29  ;;  %p323_p8 = scmp.lt.s32.totalorder %s317_s26, %s317_s26 }
  0x49   :  { %v131_v36 = vstv %s244_s30  ;;  %s250_s3 = sld [smem:[#allocation2 + $0x201]]  ;;  %v109_v48 = vadd.f32 %v108_v37, %v106_v35 }
  0x4a   :  { %v121_v38 = vadd.f32 %v120_v29, %v117_v32  ;;  %v132_v39 = vmul.f32 %v131_v36, %v399_v0  ;;  %v134_v40 = vstv %s245_s6  ;;  %s251_s4 = sld [smem:[#allocation2 + $0x202]]  ;;  %p324_p9 = por %p323_p8, %p322_p7 }
  0x4b   :  { %v135_v42 = vmul.f32 %v134_v40, %v404_v1  ;;  %v138_v43 = vstv %s246_s0  ;;  %s252_s10 = sld [smem:[#allocation2 + $0x203]]  ;;  %v110_v60 = vmax.f32 %v109_v48, 0.0 }
  0x4c   :  { %v125_v45 = vadd.f32 %v124_v33, %v121_v38  ;;  %v139_v46 = vmul.f32 %v138_v43, %v411_v6  ;;  %v142_v47 = vstv %s247_s7  ;;  %s441_s11 = sld [smem:[#allocation5 + $0x200]]  ;;  %p325_p10 = pnand %p324_p9, %p318_p6 }
  0x4d   :  { %v136_v49 = vadd.f32 %v135_v42, %v132_v39  ;;  %v143_v50 = vmul.f32 %v142_v47, %v420_v13  ;;  %s168_s12 = sld [smem:[#allocation7]]  ;;  %v146_v57 = vstv %s432_s8 }
  0x4e   :  { %v128_v51 = vadd.f32 %v127_v41, %v125_v45  ;;  %v150_v52 = vstv %s249_s9  ;;  %s254_s13 = sld [smem:[#allocation7 + $0x1]] }
  0x4f   :  { %v140_v53 = vadd.f32 %v139_v46, %v136_v49  ;;  %v151_v54 = vmul.f32 %v150_v52, %v399_v0  ;;  %v153_v55 = vstv %s250_s3  ;;  %s255_s14 = sld [smem:[#allocation7 + $0x2]] }
  0x50   :  { %v154_v58 = vmul.f32 %v153_v55, %v404_v1  ;;  %v157_v59 = vstv %s251_s4  ;;  %s256_s15 = sld [smem:[#allocation7 + $0x3]]  ;;  %v129_v2 = vmax.f32 %v128_v51, 0.0 }
  0x51   :  { %v144_v61 = vadd.f32 %v143_v50, %v140_v53  ;;  %v158_v62 = vmul.f32 %v157_v59, %v411_v6  ;;  %v161_v63 = vstv %s252_s10  ;;  %s448_s16 = sld [smem:[#allocation7 + $0x4]] }
  0x52   :  { %v155_v3 = vadd.f32 %v154_v58, %v151_v54  ;;  %v162_v0 = vmul.f32 %v161_v63, %v420_v13  ;;  %s451_s17 = sld [smem:[#allocation8]]  ;;  %v165_v10 = vstv %s441_s11 }
  0x53   :  { %v147_v4 = vadd.f32 %v146_v57, %v144_v61  ;;  %v169_v5 = vstv %s168_s12  ;;  %s258_s18 = sld [smem:[#allocation7 + $0x80]] }
  0x54   :  { %v159_v1 = vadd.f32 %v158_v62, %v155_v3  ;;  %v170_v7 = vmul.f32 %v169_v5, %v91_v56  ;;  %v172_v8 = vstv %s254_s13  ;;  %s259_s19 = sld [smem:[#allocation7 + $0x81]] }
  0x55   :  { %v148_v9 = vmax.f32 %v147_v4, 0.0  ;;  %v173_v6 = vmul.f32 %v172_v8, %v110_v60  ;;  %v176_v11 = vstv %s255_s14  ;;  %s260_s20 = sld [smem:[#allocation7 + $0x82]] }
  0x56   :  { %v163_v12 = vadd.f32 %v162_v0, %v159_v1  ;;  %v177_v14 = vmul.f32 %v176_v11, %v129_v2  ;;  %v180_v15 = vstv %s256_s15  ;;  %s261_s21 = sld [smem:[#allocation7 + $0x83]] }
  0x57   :  { %v174_v13 = vadd.f32 %v173_v6, %v170_v7  ;;  %v181_v16 = vmul.f32 %v180_v15, %v148_v9  ;;  %s262_s22 = sld [smem:[#allocation7 + $0x84]]  ;;  %v184_v19 = vstv %s448_s16 }
  0x58   :  { %v166_v17 = vadd.f32 %v165_v10, %v163_v12  ;;  %s263_s23 = sld [smem:[#allocation8 + $0x80]]  ;;  %v188_v30 = vstv %s451_s17 }
  0x59   :  { %v178_v18 = vadd.f32 %v177_v14, %v174_v13  ;;  %v192_v20 = vstv %s258_s18 }
  0x5a   :  { %v167_v21 = vmax.f32 %v166_v17, 0.0  ;;  %v193_v22 = vmul.f32 %v192_v20, %v91_v56  ;;  %v195_v23 = vstv %s259_s19 }
  0x5b   :  { %v182_v24 = vadd.f32 %v181_v16, %v178_v18  ;;  %v196_v25 = vmul.f32 %v195_v23, %v110_v60  ;;  %v199_v26 = vstv %s260_s20 }
  0x5c   :  { %v185_v27 = vmul.f32 %v184_v19, %v167_v21  ;;  %v200_v28 = vmul.f32 %v199_v26, %v129_v2  ;;  %v203_v29 = vstv %s261_s21 }
  0x5d   :  { %v197_v31 = vadd.f32 %v196_v25, %v193_v22  ;;  %v204_v32 = vmul.f32 %v203_v29, %v148_v9  ;;  %v207_v33 = vstv %s262_s22 }
  0x5e   :  { %v186_v34 = vadd.f32 %v185_v27, %v182_v24  ;;  %v208_v36 = vmul.f32 %v207_v33, %v167_v21  ;;  %v211_v39 = vstv %s263_s23 }
  0x5f   :  { %v201_v35 = vadd.f32 %v200_v28, %v197_v31 }
  0x60   :  { %v189_v37 = vadd.f32 %v188_v30, %v186_v34 }
  0x61   :  { %v205_v38 = vadd.f32 %v204_v32, %v201_v35 }
  0x62   :  { %190 = vst [vmem:[#allocation10] sm:$0x1] %v189_v37 }
  0x63   :  { %v209_v40 = vadd.f32 %v208_v36, %v205_v38 }
  0x65   :  { %v212_v41 = vadd.f32 %v211_v39, %v209_v40 }
  0x67   :  { %213 = vst [vmem:[#allocation10 + $0x1] sm:$0x1] %v212_v41 }
  0x68   :  { %328 = shalt.err (!%p325_p10)
}
  0x69   :  { %223 = dma.vmem_to_hbm [thread:$0]  %s221_s25, 32, %s464_s5, [#allocation3]  }
  0x6a   :  { %343 = dma.done.wait [#allocation3], 32  }
  0x6b   :  { %344 = vsyncadd [#allocation3], 4294967264 }
  0x6c   :  { %227 = vsyncpa [#allocation3], 1 }
  0x6d   :  { %228 = vsyncpa [#allocation4], 1 }
  0x6e   :  { %229 = vsyncpa [#allocation6], 1 }
  0x6f   :  { %230 = vsyncpa [#allocation9], 1 }

</bundles_post_ra>
